<compile_context>
chip_gen: v5e
topology: v5e:2x2
jax: 0.10.0
libtpu: 0.0.40
codegen_flags: <defaults>
</compile_context>

<pallas_src>
import functools
import math

import jax
import jax.numpy as jnp
from jax import lax
from jax.experimental import pallas as pl
from jax.experimental.pallas import tpu as pltpu

LANES = 128       # vreg lane width; last dim of every tile
ROW_ALIGN = 32    # row granularity of a block; also the in-kernel strip height


def _cdiv(a, b):
    return -(-a // b)


def _round_up(x, m):
    return _cdiv(x, m) * m


def _plan(n, block_rows):
    """Row-block plan: minimal padding, >=2 'parallel' steps when there is
    enough work (uses both TensorCores on v7x, ~free on v5e/v6e)."""
    rows = max(1, _cdiv(n, LANES))
    steps = max(1, _cdiv(rows, block_rows))
    if rows >= 2 * ROW_ALIGN:
        steps = max(steps, 2)
    r_blk = _round_up(_cdiv(rows, steps), ROW_ALIGN)
    return steps, r_blk, steps * r_blk


def _peak_params(params):
    """Host-side precompute of (a, w, L, G, phi) per peak."""
    a = params["a"].astype(jnp.float32)
    f = params["f"].astype(jnp.float32)
    d = params["d"].astype(jnp.float32)
    phi = params["phi"].astype(jnp.float32)
    g = params["g"].astype(jnp.float32)
    w = (2.0 * math.pi) * f          # angular frequency [rad/s]
    lor = d * (1.0 - g)              # Lorentzian damping rate   [Hz]
    gau = d * g                      # Gaussian damping factor   [Hz/s]
    return a, w, lor, gau, phi


# --------------------------------------------------------------------------
# Fast path: uniform dwell-time grid, factorized kernel.
# --------------------------------------------------------------------------
def _factor_tables(params, t0, dt, rows_pad, num_peaks):
    """Row table (rows_pad, 4K): per peak [rowmag, cos(wT), sin(wT), -2*G*T].
    Lane table (2K+1, 128): per peak [lanemag*cos(phi+w*tau),
    lanemag*sin(phi+w*tau)], last row = tau.  Both are ~128x smaller than the
    output, so this jnp prologue is negligible vs. the kernel."""
    a, w, lor, gau, phi = _peak_params(params)

    # Row part: T_r = t0 + (128*dt)*r
    t_row = t0 + (LANES * dt) * jnp.arange(rows_pad, dtype=jnp.float32)
    tc = t_row[:, None]                                             # (rows,1)
    rowmag = a[None, :] * jnp.exp(-(lor[None, :] * tc + gau[None, :] * tc * tc))
    ca = jnp.cos(w[None, :] * tc)
    sa = jnp.sin(w[None, :] * tc)
    q = (-2.0) * gau[None, :] * tc                                  # cross-term row factor
    rowtab = jnp.stack([rowmag, ca, sa, q], axis=-1).reshape(rows_pad, 4 * num_peaks)

    # Lane part: tau_l = dt*l, l = 0..127
    tl = (dt * jnp.arange(LANES, dtype=jnp.float32))[None, :]       # (1,128)
    lanemag = jnp.exp(-(lor[:, None] * tl + gau[:, None] * tl * tl))
    cb = lanemag * jnp.cos(phi[:, None] + w[:, None] * tl)
    sb = lanemag * jnp.sin(phi[:, None] + w[:, None] * tl)
    lanetab = jnp.concatenate(
        [jnp.stack([cb, sb], axis=1).reshape(2 * num_peaks, LANES), tl], axis=0)
    return rowtab, lanetab


def _amares_uniform_kernel(rowtab_ref, lanetab_ref, yr_ref, yi_ref, *, num_peaks):
    k_count = num_peaks
    r_blk = yr_ref.shape[0]
    strip = ROW_ALIGN
    n_strips = r_blk // strip

    # Hoisted once per grid step: lane factors stay resident in a few vregs.
    lt = lanetab_ref[...]                                   # (2K+1, 128)
    tau = lt[2 * k_count:2 * k_count + 1, :]                # (1, 128)
    lane_cb = [lt[2 * k:2 * k + 1, :] for k in range(k_count)]
    lane_sb = [lt[2 * k + 1:2 * k + 2, :] for k in range(k_count)]

    def strip_body(s, carry):
        r0 = pl.multiple_of(s * strip, strip)
        rt = rowtab_ref[pl.ds(r0, strip), :]                # (strip, 4K)
        acc_r = jnp.zeros((strip, LANES), jnp.float32)
        acc_i = jnp.zeros((strip, LANES), jnp.float32)
        for k in range(k_count):
            rm = rt[:, 4 * k + 0:4 * k + 1]                 # a*exp(-(L*T+G*T^2))  (strip,1)
            ca = rt[:, 4 * k + 1:4 * k + 2]                 # cos(w*T)
            sa = rt[:, 4 * k + 2:4 * k + 3]                 # sin(w*T)
            q = rt[:, 4 * k + 3:4 * k + 4]                  # -2*G*T
            # Single full-tile transcendental per peak: Gaussian cross term.
            mag = rm * jnp.exp(q * tau)                     # (strip, 128)
            acc_r = acc_r + mag * (ca * lane_cb[k] - sa * lane_sb[k])
            acc_i = acc_i + mag * (sa * lane_cb[k] + ca * lane_sb[k])
        yr_ref[pl.ds(r0, strip), :] = acc_r
        yi_ref[pl.ds(r0, strip), :] = acc_i
        return carry

    lax.fori_loop(0, n_strips, strip_body, 0, unroll=False)


def amares_forward_uniform_parts(params, t0, dt, n, *, block_rows=2048):
    """Real/imag parts (each (n,) f32) of the AMARES signal on the uniform
    grid t_n = t0 + n*dt.  Perf-sensitive consumers (residual/loss) should use
    these directly rather than the complex64 repack."""
    num_peaks = int(params["a"].shape[0])
    steps, r_blk, rows_pad = _plan(n, block_rows)
    rowtab, lanetab = _factor_tables(params, float(t0), float(dt), rows_pad, num_peaks)

    kernel = functools.partial(_amares_uniform_kernel, num_peaks=num_peaks)
    yr, yi = pl.pallas_call(
        kernel,
        out_shape=(
            jax.ShapeDtypeStruct((rows_pad, LANES), jnp.float32),
            jax.ShapeDtypeStruct((rows_pad, LANES), jnp.float32),
        ),
        grid=(steps,),
        in_specs=[
            pl.BlockSpec((r_blk, 4 * num_peaks), lambda i: (i, 0)),
            pl.BlockSpec((2 * num_peaks + 1, LANES), lambda i: (0, 0)),
        ],
        out_specs=(
            pl.BlockSpec((r_blk, LANES), lambda i: (i, 0)),
            pl.BlockSpec((r_blk, LANES), lambda i: (i, 0)),
        ),
        compiler_params=pltpu.CompilerParams(
            dimension_semantics=("parallel",)),
    )(rowtab, lanetab)
    return yr.reshape(-1)[:n], yi.reshape(-1)[:n]


def amares_forward_uniform(params, t0, dt, n, *, block_rows=2048):
    yr, yi = amares_forward_uniform_parts(params, t0, dt, n, block_rows=block_rows)
    return lax.complex(yr, yi)       # complex64, matches the PyTorch module


# --------------------------------------------------------------------------
# General path: arbitrary (possibly non-uniform) 1-D time grid.
# --------------------------------------------------------------------------
def _amares_general_kernel(ptab_ref, t_ref, yr_ref, yi_ref, *, num_peaks):
    """ptab_ref: SMEM (5*K,) flat table rows=[a, w, L, G, phi]."""
    t = t_ref[...]                                # (r_blk, 128) f32
    acc_r = jnp.zeros_like(t)
    acc_i = jnp.zeros_like(t)
    for k in range(num_peaks):
        a = ptab_ref[0 * num_peaks + k]
        w = ptab_ref[1 * num_peaks + k]
        lor = ptab_ref[2 * num_peaks + k]
        gau = ptab_ref[3 * num_peaks + k]
        phi = ptab_ref[4 * num_peaks + k]
        mag = a * jnp.exp(-(t * (lor + gau * t)))
        ang = phi + w * t
        acc_r = acc_r + mag * jnp.cos(ang)
        acc_i = acc_i + mag * jnp.sin(ang)
    yr_ref[...] = acc_r
    yi_ref[...] = acc_i


def amares_forward(params, t, *, block_rows=512):
    """General fallback matching the module's forward for arbitrary 1-D t."""
    num_peaks = int(params["a"].shape[0])
    n = int(t.shape[0])
    steps, r_blk, rows_pad = _plan(n, block_rows)
    n_pad = rows_pad * LANES
    t2d = (jnp.zeros((n_pad,), jnp.float32)
           .at[:n].set(t.astype(jnp.float32))
           .reshape(rows_pad, LANES))
    a, w, lor, gau, phi = _peak_params(params)
    ptab = jnp.concatenate([a, w, lor, gau, phi])

    kernel = functools.partial(_amares_general_kernel, num_peaks=num_peaks)
    yr, yi = pl.pallas_call(
        kernel,
        out_shape=(
            jax.ShapeDtypeStruct((rows_pad, LANES), jnp.float32),
            jax.ShapeDtypeStruct((rows_pad, LANES), jnp.float32),
        ),
        grid_spec=pltpu.PrefetchScalarGridSpec(
            num_scalar_prefetch=1,
            grid=(steps,),
            in_specs=[pl.BlockSpec((r_blk, LANES), lambda i, p: (i, 0))],
            out_specs=(
                pl.BlockSpec((r_blk, LANES), lambda i, p: (i, 0)),
                pl.BlockSpec((r_blk, LANES), lambda i, p: (i, 0)),
            ),
        ),
        compiler_params=pltpu.CompilerParams(
            dimension_semantics=("parallel",)),
    )(ptab, t2d)
    return lax.complex(yr.reshape(-1)[:n], yi.reshape(-1)[:n])


# --------------------------------------------------------------------------
# Plain-JAX reference (mirrors the PyTorch forward).
# --------------------------------------------------------------------------
def _reference_forward(params, t):
    a = params["a"][:, None].astype(jnp.float32)
    f = params["f"][:, None].astype(jnp.float32)
    d = params["d"][:, None].astype(jnp.float32)
    phi = params["phi"][:, None].astype(jnp.float32)
    g = params["g"][:, None].astype(jnp.float32)
    tb = t[None, :].astype(jnp.float32)
    complex_phase = jnp.exp(1j * phi.astype(jnp.complex64))
    lor = d * (1.0 - g)
    gau = d * g
    damping = jnp.exp(-(lor * tb + gau * tb ** 2)).astype(jnp.complex64)
    osc = jnp.exp(1j * (2.0 * jnp.pi * f * tb).astype(jnp.complex64))
    sig = a.astype(jnp.complex64) * complex_phase * damping * osc
    return jnp.sum(sig, axis=0)


if __name__ == "__main__":
    key = jax.random.PRNGKey(0)
    num_peaks = 4
    k_a, k_f, k_d, k_phi, k_g = jax.random.split(key, 5)
    params = {
        "a":   jax.random.uniform(k_a,   (num_peaks,), jnp.float32, 0.5, 2.0),
        "f":   jax.random.uniform(k_f,   (num_peaks,), jnp.float32, -200.0, 200.0),
        "d":   jax.random.uniform(k_d,   (num_peaks,), jnp.float32, 5.0, 50.0),
        "phi": jax.random.uniform(k_phi, (num_peaks,), jnp.float32, -math.pi, math.pi),
        "g":   jax.random.uniform(k_g,   (num_peaks,), jnp.float32, 0.0, 1.0),
    }
    dt = 5e-4                         # 0.5 ms dwell time
    n1 = 256
    t1 = jnp.arange(n1, dtype=jnp.float32) * dt

    y_uni = amares_forward_uniform(params, 0.0, dt, n1)   # factorized fast path
    y_gen = amares_forward(params, t1)                    # general fallback
    y_uni, y_gen = jax.block_until_ready((y_uni, y_gen))

    y_ref = _reference_forward(params, t1)
    assert y_uni.shape == (n1,) and y_uni.dtype == jnp.complex64
    assert y_gen.shape == (n1,) and y_gen.dtype == jnp.complex64
    # The factorized path evaluates the f32 phase via angle addition, so it can
    # differ from the monolithic reference by a few ULP of the phase argument.
    assert jnp.allclose(y_uni, y_ref, atol=5e-4, rtol=5e-4)
    assert jnp.allclose(y_gen, y_ref, atol=2e-4, rtol=2e-4)

    # Larger case exercising the multi-step 'parallel' grid (2 steps x 96 rows),
    # the 32-row strip loop (3 strips/step) and the ragged tail slice.
    n2 = 20000
    t2 = jnp.arange(n2, dtype=jnp.float32) * dt
    y2 = jax.block_until_ready(amares_forward_uniform(params, 0.0, dt, n2))
    assert jnp.allclose(y2, _reference_forward(params, t2), atol=1e-3, rtol=1e-3)

    print("KERNEL_OK")
</pallas_src>

<mosaic_0001>
module attributes {stable_mosaic.version = 11 : i64} {
  func.func @_amares_uniform_kernel(%arg0: i32, %arg1: memref<32x16xf32, #tpu.memory_space<vmem>>, %arg2: memref<9x128xf32, #tpu.memory_space<vmem>>, %arg3: memref<32x128xf32, #tpu.memory_space<vmem>>, %arg4: memref<32x128xf32, #tpu.memory_space<vmem>>) attributes {dimension_semantics = [#tpu.dimension_semantics<parallel>], iteration_bounds = array<i64: 1>, scalar_prefetch = 0 : i64, scratch_operands = 0 : i64, tpu.core_type = #tpu.core_type<tc>, window_params = [{transform_indices = @transform_0, window_bounds = array<i64: 32, 16>}, {pipeline_mode = #tpu.pipeline_mode<synchronous>, transform_indices = @transform_1, window_bounds = array<i64: 9, 128>}, {transform_indices = @transform_2, window_bounds = array<i64: 32, 128>}, {transform_indices = @transform_3, window_bounds = array<i64: 32, 128>}]} {
    %c0 = arith.constant 0 : index
    %c0_0 = arith.constant 0 : index
    %0 = vector.load %arg2[%c0, %c0_0] : memref<9x128xf32, #tpu.memory_space<vmem>>, vector<9x128xf32>
    %1 = vector.extract_strided_slice %0 {offsets = [8, 0], sizes = [1, 128], strides = [1, 1]} : vector<9x128xf32> to vector<1x128xf32>
    %2 = vector.extract_strided_slice %0 {offsets = [0, 0], sizes = [1, 128], strides = [1, 1]} : vector<9x128xf32> to vector<1x128xf32>
    %3 = vector.extract_strided_slice %0 {offsets = [2, 0], sizes = [1, 128], strides = [1, 1]} : vector<9x128xf32> to vector<1x128xf32>
    %4 = vector.extract_strided_slice %0 {offsets = [4, 0], sizes = [1, 128], strides = [1, 1]} : vector<9x128xf32> to vector<1x128xf32>
    %5 = vector.extract_strided_slice %0 {offsets = [6, 0], sizes = [1, 128], strides = [1, 1]} : vector<9x128xf32> to vector<1x128xf32>
    %6 = vector.extract_strided_slice %0 {offsets = [1, 0], sizes = [1, 128], strides = [1, 1]} : vector<9x128xf32> to vector<1x128xf32>
    %7 = vector.extract_strided_slice %0 {offsets = [3, 0], sizes = [1, 128], strides = [1, 1]} : vector<9x128xf32> to vector<1x128xf32>
    %8 = vector.extract_strided_slice %0 {offsets = [5, 0], sizes = [1, 128], strides = [1, 1]} : vector<9x128xf32> to vector<1x128xf32>
    %9 = vector.extract_strided_slice %0 {offsets = [7, 0], sizes = [1, 128], strides = [1, 1]} : vector<9x128xf32> to vector<1x128xf32>
    %c0_i32 = arith.constant 0 : i32
    %c32_i32 = arith.constant 32 : i32
    %10 = arith.muli %c0_i32, %c32_i32 : i32
    %11 = tpu.assume_multiple %10, 32 : i32
    %12 = arith.index_cast %11 : i32 to index
    %c0_1 = arith.constant 0 : index
    %13 = vector.load %arg1[%12, %c0_1] : memref<32x16xf32, #tpu.memory_space<vmem>>, vector<32x16xf32>
    %cst = arith.constant 0.000000e+00 : f32
    %14 = vector.broadcast %cst : f32 to vector<32x128xf32>
    %cst_2 = arith.constant 0.000000e+00 : f32
    %15 = vector.broadcast %cst_2 : f32 to vector<32x128xf32>
    %16 = vector.extract_strided_slice %13 {offsets = [0, 0], sizes = [32, 1], strides = [1, 1]} : vector<32x16xf32> to vector<32x1xf32>
    %17 = vector.extract_strided_slice %13 {offsets = [0, 1], sizes = [32, 1], strides = [1, 1]} : vector<32x16xf32> to vector<32x1xf32>
    %18 = vector.extract_strided_slice %13 {offsets = [0, 2], sizes = [32, 1], strides = [1, 1]} : vector<32x16xf32> to vector<32x1xf32>
    %19 = vector.extract_strided_slice %13 {offsets = [0, 3], sizes = [32, 1], strides = [1, 1]} : vector<32x16xf32> to vector<32x1xf32>
    %20 = vector.broadcast %19 : vector<32x1xf32> to vector<32x128xf32>
    %21 = vector.broadcast %1 : vector<1x128xf32> to vector<32x128xf32>
    %22 = arith.mulf %20, %21 : vector<32x128xf32>
    %23 = math.exp %22 : vector<32x128xf32>
    %24 = vector.broadcast %16 : vector<32x1xf32> to vector<32x128xf32>
    %25 = arith.mulf %24, %23 : vector<32x128xf32>
    %26 = vector.broadcast %17 : vector<32x1xf32> to vector<32x128xf32>
    %27 = vector.broadcast %2 : vector<1x128xf32> to vector<32x128xf32>
    %28 = arith.mulf %26, %27 : vector<32x128xf32>
    %29 = vector.broadcast %18 : vector<32x1xf32> to vector<32x128xf32>
    %30 = vector.broadcast %6 : vector<1x128xf32> to vector<32x128xf32>
    %31 = arith.mulf %29, %30 : vector<32x128xf32>
    %32 = arith.subf %28, %31 : vector<32x128xf32>
    %33 = arith.mulf %25, %32 : vector<32x128xf32>
    %34 = arith.addf %14, %33 : vector<32x128xf32>
    %35 = vector.broadcast %18 : vector<32x1xf32> to vector<32x128xf32>
    %36 = vector.broadcast %2 : vector<1x128xf32> to vector<32x128xf32>
    %37 = arith.mulf %35, %36 : vector<32x128xf32>
    %38 = vector.broadcast %17 : vector<32x1xf32> to vector<32x128xf32>
    %39 = vector.broadcast %6 : vector<1x128xf32> to vector<32x128xf32>
    %40 = arith.mulf %38, %39 : vector<32x128xf32>
    %41 = arith.addf %37, %40 : vector<32x128xf32>
    %42 = arith.mulf %25, %41 : vector<32x128xf32>
    %43 = arith.addf %15, %42 : vector<32x128xf32>
    %44 = vector.extract_strided_slice %13 {offsets = [0, 4], sizes = [32, 1], strides = [1, 1]} : vector<32x16xf32> to vector<32x1xf32>
    %45 = vector.extract_strided_slice %13 {offsets = [0, 5], sizes = [32, 1], strides = [1, 1]} : vector<32x16xf32> to vector<32x1xf32>
    %46 = vector.extract_strided_slice %13 {offsets = [0, 6], sizes = [32, 1], strides = [1, 1]} : vector<32x16xf32> to vector<32x1xf32>
    %47 = vector.extract_strided_slice %13 {offsets = [0, 7], sizes = [32, 1], strides = [1, 1]} : vector<32x16xf32> to vector<32x1xf32>
    %48 = vector.broadcast %47 : vector<32x1xf32> to vector<32x128xf32>
    %49 = vector.broadcast %1 : vector<1x128xf32> to vector<32x128xf32>
    %50 = arith.mulf %48, %49 : vector<32x128xf32>
    %51 = math.exp %50 : vector<32x128xf32>
    %52 = vector.broadcast %44 : vector<32x1xf32> to vector<32x128xf32>
    %53 = arith.mulf %52, %51 : vector<32x128xf32>
    %54 = vector.broadcast %45 : vector<32x1xf32> to vector<32x128xf32>
    %55 = vector.broadcast %3 : vector<1x128xf32> to vector<32x128xf32>
    %56 = arith.mulf %54, %55 : vector<32x128xf32>
    %57 = vector.broadcast %46 : vector<32x1xf32> to vector<32x128xf32>
    %58 = vector.broadcast %7 : vector<1x128xf32> to vector<32x128xf32>
    %59 = arith.mulf %57, %58 : vector<32x128xf32>
    %60 = arith.subf %56, %59 : vector<32x128xf32>
    %61 = arith.mulf %53, %60 : vector<32x128xf32>
    %62 = arith.addf %34, %61 : vector<32x128xf32>
    %63 = vector.broadcast %46 : vector<32x1xf32> to vector<32x128xf32>
    %64 = vector.broadcast %3 : vector<1x128xf32> to vector<32x128xf32>
    %65 = arith.mulf %63, %64 : vector<32x128xf32>
    %66 = vector.broadcast %45 : vector<32x1xf32> to vector<32x128xf32>
    %67 = vector.broadcast %7 : vector<1x128xf32> to vector<32x128xf32>
    %68 = arith.mulf %66, %67 : vector<32x128xf32>
    %69 = arith.addf %65, %68 : vector<32x128xf32>
    %70 = arith.mulf %53, %69 : vector<32x128xf32>
    %71 = arith.addf %43, %70 : vector<32x128xf32>
    %72 = vector.extract_strided_slice %13 {offsets = [0, 8], sizes = [32, 1], strides = [1, 1]} : vector<32x16xf32> to vector<32x1xf32>
    %73 = vector.extract_strided_slice %13 {offsets = [0, 9], sizes = [32, 1], strides = [1, 1]} : vector<32x16xf32> to vector<32x1xf32>
    %74 = vector.extract_strided_slice %13 {offsets = [0, 10], sizes = [32, 1], strides = [1, 1]} : vector<32x16xf32> to vector<32x1xf32>
    %75 = vector.extract_strided_slice %13 {offsets = [0, 11], sizes = [32, 1], strides = [1, 1]} : vector<32x16xf32> to vector<32x1xf32>
    %76 = vector.broadcast %75 : vector<32x1xf32> to vector<32x128xf32>
    %77 = vector.broadcast %1 : vector<1x128xf32> to vector<32x128xf32>
    %78 = arith.mulf %76, %77 : vector<32x128xf32>
    %79 = math.exp %78 : vector<32x128xf32>
    %80 = vector.broadcast %72 : vector<32x1xf32> to vector<32x128xf32>
    %81 = arith.mulf %80, %79 : vector<32x128xf32>
    %82 = vector.broadcast %73 : vector<32x1xf32> to vector<32x128xf32>
    %83 = vector.broadcast %4 : vector<1x128xf32> to vector<32x128xf32>
    %84 = arith.mulf %82, %83 : vector<32x128xf32>
    %85 = vector.broadcast %74 : vector<32x1xf32> to vector<32x128xf32>
    %86 = vector.broadcast %8 : vector<1x128xf32> to vector<32x128xf32>
    %87 = arith.mulf %85, %86 : vector<32x128xf32>
    %88 = arith.subf %84, %87 : vector<32x128xf32>
    %89 = arith.mulf %81, %88 : vector<32x128xf32>
    %90 = arith.addf %62, %89 : vector<32x128xf32>
    %91 = vector.broadcast %74 : vector<32x1xf32> to vector<32x128xf32>
    %92 = vector.broadcast %4 : vector<1x128xf32> to vector<32x128xf32>
    %93 = arith.mulf %91, %92 : vector<32x128xf32>
    %94 = vector.broadcast %73 : vector<32x1xf32> to vector<32x128xf32>
    %95 = vector.broadcast %8 : vector<1x128xf32> to vector<32x128xf32>
    %96 = arith.mulf %94, %95 : vector<32x128xf32>
    %97 = arith.addf %93, %96 : vector<32x128xf32>
    %98 = arith.mulf %81, %97 : vector<32x128xf32>
    %99 = arith.addf %71, %98 : vector<32x128xf32>
    %100 = vector.extract_strided_slice %13 {offsets = [0, 12], sizes = [32, 1], strides = [1, 1]} : vector<32x16xf32> to vector<32x1xf32>
    %101 = vector.extract_strided_slice %13 {offsets = [0, 13], sizes = [32, 1], strides = [1, 1]} : vector<32x16xf32> to vector<32x1xf32>
    %102 = vector.extract_strided_slice %13 {offsets = [0, 14], sizes = [32, 1], strides = [1, 1]} : vector<32x16xf32> to vector<32x1xf32>
    %103 = vector.extract_strided_slice %13 {offsets = [0, 15], sizes = [32, 1], strides = [1, 1]} : vector<32x16xf32> to vector<32x1xf32>
    %104 = vector.broadcast %103 : vector<32x1xf32> to vector<32x128xf32>
    %105 = vector.broadcast %1 : vector<1x128xf32> to vector<32x128xf32>
    %106 = arith.mulf %104, %105 : vector<32x128xf32>
    %107 = math.exp %106 : vector<32x128xf32>
    %108 = vector.broadcast %100 : vector<32x1xf32> to vector<32x128xf32>
    %109 = arith.mulf %108, %107 : vector<32x128xf32>
    %110 = vector.broadcast %101 : vector<32x1xf32> to vector<32x128xf32>
    %111 = vector.broadcast %5 : vector<1x128xf32> to vector<32x128xf32>
    %112 = arith.mulf %110, %111 : vector<32x128xf32>
    %113 = vector.broadcast %102 : vector<32x1xf32> to vector<32x128xf32>
    %114 = vector.broadcast %9 : vector<1x128xf32> to vector<32x128xf32>
    %115 = arith.mulf %113, %114 : vector<32x128xf32>
    %116 = arith.subf %112, %115 : vector<32x128xf32>
    %117 = arith.mulf %109, %116 : vector<32x128xf32>
    %118 = arith.addf %90, %117 : vector<32x128xf32>
    %119 = vector.broadcast %102 : vector<32x1xf32> to vector<32x128xf32>
    %120 = vector.broadcast %5 : vector<1x128xf32> to vector<32x128xf32>
    %121 = arith.mulf %119, %120 : vector<32x128xf32>
    %122 = vector.broadcast %101 : vector<32x1xf32> to vector<32x128xf32>
    %123 = vector.broadcast %9 : vector<1x128xf32> to vector<32x128xf32>
    %124 = arith.mulf %122, %123 : vector<32x128xf32>
    %125 = arith.addf %121, %124 : vector<32x128xf32>
    %126 = arith.mulf %109, %125 : vector<32x128xf32>
    %127 = arith.addf %99, %126 : vector<32x128xf32>
    %128 = arith.index_cast %11 : i32 to index
    %c0_3 = arith.constant 0 : index
    %129 = vector.load %arg3[%128, %c0_3] : memref<32x128xf32, #tpu.memory_space<vmem>>, vector<32x128xf32>
    tpu.vector_store %arg3[%128, %c0_3], %118 {strides = array<i32>} : memref<32x128xf32, #tpu.memory_space<vmem>>, vector<32x128xf32>,
    %130 = arith.index_cast %11 : i32 to index
    %c0_4 = arith.constant 0 : index
    %131 = vector.load %arg4[%130, %c0_4] : memref<32x128xf32, #tpu.memory_space<vmem>>, vector<32x128xf32>
    tpu.vector_store %arg4[%130, %c0_4], %127 {strides = array<i32>} : memref<32x128xf32, #tpu.memory_space<vmem>>, vector<32x128xf32>,
    %c1_i32 = arith.constant 1 : i32
    return
  }
  func.func @transform_0(%arg0: i32) -> (i32, i32) {
    %c0_i32 = arith.constant 0 : i32
    %c0_i32_0 = arith.constant 0 : i32
    return %arg0, %c0_i32 : i32, i32
  }
  func.func @transform_1(%arg0: i32) -> (i32, i32) {
    %c0_i32 = arith.constant 0 : i32
    %c0_i32_0 = arith.constant 0 : i32
    %c0_i32_1 = arith.constant 0 : i32
    return %c0_i32, %c0_i32_0 : i32, i32
  }
  func.func @transform_2(%arg0: i32) -> (i32, i32) {
    %c0_i32 = arith.constant 0 : i32
    %c0_i32_0 = arith.constant 0 : i32
    return %arg0, %c0_i32 : i32, i32
  }
  func.func @transform_3(%arg0: i32) -> (i32, i32) {
    %c0_i32 = arith.constant 0 : i32
    %c0_i32_0 = arith.constant 0 : i32
    return %arg0, %c0_i32 : i32, i32
  }
}

</mosaic_0001>

<bundles_post_ra>
// kernel: tpu_custom_call.1
= control target key start
LH: loop header
LB: loop body
LE: loop exit
PB: predicated region body
PF: predicated region fallthrough
CT: control target
= control target key end

     0   :  { %9 = vsyncpa [#allocation3], 0  ;;  %v707_v2 = vmov 0   ;;  %v708_v3 = vmov 3   ;;  %s1036_s0 = inlined_call_operand.vmem [shape: f32[32,16], index: 0, kind: input, shape index: {}]   ;;  %s1037_s1 = inlined_call_operand.vmem [shape: f32[9,128], index: 1, kind: input, shape index: {}]   ;;  %s1038_s2 = inlined_call_operand.hbm [shape: f32[32,128], index: 2, kind: output, shape index: {0}]   ;;  %s1039_s3 = inlined_call_operand.hbm [shape: f32[32,128], index: 3, kind: output, shape index: {1}]  }
   0x1   :  { %v750_v0 = vld [vmem:[%s1036_s0 + $0x10] sm:$0xff]  ;;  %v755_v1 = vld [vmem:[%s1036_s0] sm:$0xff]  ;;  %580 = vset.pattern.permute.xlu2 %v707_v2  ;;  %579 = vset.pattern.permute.xlu1 %v708_v3 }
   0x2   :  { %10 = vsyncpa [#allocation5], 0  ;;  %578 = vset.pattern.permute.xlu0 %v708_v3  ;;  %33 = vperm.xlu1 %579, %v750_v0   ;;  %v763_v4 = vld [vmem:[%s1036_s0 + $0x18] sm:$0xff]  ;;  %v768_v5 = vld [vmem:[%s1036_s0 + $0x8] sm:$0xff]  ;;  %v709_v6 = vmov 1   ;;  %v710_v7 = vmov 2  }
   0x3   :  { %55 = vperm.xlu2 %580, %v755_v1   ;;  %23 = vperm.xlu0 %578, %v755_v1   ;;  %v711_v8 = vmov 7   ;;  %v712_v9 = vmov 4   ;;  %v713_v10 = vmov 5   ;;  %v714_v11 = vmov 6   ;;  %v811_v19 = vld [vmem:[%s1037_s1 + $0x8] ss:$0 sm:$0xff] }
   0x4   :  { %v715_v12 = vmov 8   ;;  %v716_v14 = vmov 9   ;;  %v717_v16 = vmov 11   ;;  %v718_v17 = vmov 10   ;;  %v829_v45 = vld [vmem:[%s1037_s1] sm:$0xff]  ;;  %s723_s1 = smov [#allocation2]  }
   0x5   :  { %v719_v31 = vmov 15   ;;  %v90_v47 = vperm.slane %v829_v45, 0  ;;  %v111_v48 = vperm.slane %v829_v45, 1  ;;  %v720_v60 = vmov 13   ;;  %s526_s23 = sshll.u32 %s723_s1, 4  ;;  %s528_s26 = sshll.u32 %s1038_s2, 4  ;;  %s527_s23 = int_to_ptr.vmem [resolvable:$true] %s526_s23  ;;  %s529_s26 = int_to_ptr.hbm [resolvable:$true] %s528_s26 }
   0x6   :  { %s724_s27 = smov [#allocation4]   ;;  %s541_s4 = sshll.u32 %s1039_s3, 4  ;;  %s542_s4 = int_to_ptr.hbm [resolvable:$true] %s541_s4 }
   0x7   :  { %s539_s28 = sshll.u32 %s724_s27, 4  ;;  %s725_s5 = smov 128   ;;  %s540_s28 = int_to_ptr.vmem [resolvable:$true] %s539_s28 }
   0x8   :  { %s726_s2 = smov 8  }
   0xa   :  { %38 = vperm.xlu1 %579, %v763_v4  }
   0xb   :  { %59 = vperm.xlu2 %580, %v768_v5   ;;  %28 = vperm.xlu0 %578, %v768_v5  }
  0x12   :  { %582 = vset.pattern.permute.xlu1 %v707_v2 }
  0x13   :  { %583 = vset.pattern.permute.xlu2 %v709_v6  ;;  %581 = vset.pattern.permute.xlu0 %v707_v2 }
  0x14   :  { %67 = vperm.xlu1 %582, %v763_v4   ;;  %75 = vperm.xlu2 %583, %v755_v1  }
  0x15   :  { %63 = vperm.xlu0 %581, %v750_v0  }
  0x1c   :  { %584 = vset.pattern.permute.xlu1 %v709_v6  ;;  %83 = vperm.xlu2 %583, %v750_v0  }
  0x1d   :  { %585 = vset.pattern.permute.xlu0 %v709_v6  ;;  %79 = vperm.xlu1 %584, %v768_v5  }
  0x1e   :  { %87 = vperm.xlu0 %585, %v763_v4  }
  0x24   :  { %587 = vset.pattern.permute.xlu2 %v710_v7 }
  0x25   :  { %586 = vset.pattern.permute.xlu1 %v710_v7  ;;  %100 = vperm.xlu2 %587, %v768_v5  }
  0x26   :  { %96 = vperm.xlu1 %586, %v755_v1   ;;  %588 = vset.pattern.permute.xlu0 %v711_v8 }
  0x27   :  { %149 = vperm.xlu0 %588, %v755_v1  }
  0x2d   :  { %108 = vperm.xlu2 %587, %v763_v4  }
  0x2e   :  { %104 = vperm.xlu1 %586, %v750_v0  }
  0x2f   :  { %592 = vset.pattern.permute.xlu0 %v712_v9 }
  0x30   :  { %181 = vperm.xlu0 %592, %v768_v5  }
  0x35   :  { %590 = vset.pattern.permute.xlu2 %v711_v8 }
  0x36   :  { %589 = vset.pattern.permute.xlu1 %v711_v8  ;;  %157 = vperm.xlu2 %590, %v750_v0  }
  0x37   :  { %153 = vperm.xlu1 %589, %v768_v5  }
  0x38   :  { %596 = vset.pattern.permute.xlu0 %v713_v10 }
  0x39   :  { %205 = vperm.xlu0 %596, %v750_v0  }
  0x3e   :  { %591 = vset.pattern.permute.xlu2 %v712_v9 }
  0x3f   :  { %161 = vperm.xlu1 %589, %v763_v4   ;;  %177 = vperm.xlu2 %591, %v755_v1  }
  0x41   :  { %599 = vset.pattern.permute.xlu0 %v714_v11 }
  0x42   :  { %230 = vperm.xlu0 %599, %v763_v4  }
  0x47   :  { %593 = vset.pattern.permute.xlu1 %v712_v9  ;;  %189 = vperm.xlu2 %591, %v763_v4  }
  0x48   :  { %185 = vperm.xlu1 %593, %v750_v0  }
  0x4a   :  { %602 = vset.pattern.permute.xlu0 %v715_v12 }
  0x4b   :  { %299 = vperm.xlu0 %602, %v755_v1  }
  0x4f   :  { %595 = vset.pattern.permute.xlu2 %v713_v10 }
  0x50   :  { %594 = vset.pattern.permute.xlu1 %v713_v10  ;;  %201 = vperm.xlu2 %595, %v768_v5  }
  0x51   :  { %197 = vperm.xlu1 %594, %v755_v1  }
  0x53   :  { %606 = vset.pattern.permute.xlu0 %v716_v14 }
  0x54   :  { %323 = vperm.xlu0 %606, %v768_v5  }
  0x58   :  { %597 = vset.pattern.permute.xlu2 %v714_v11 }
  0x59   :  { %209 = vperm.xlu1 %594, %v763_v4   ;;  %218 = vperm.xlu2 %597, %v755_v1  }
  0x5c   :  { %610 = vset.pattern.permute.xlu0 %v718_v17 }
  0x5d   :  { %v56_v13 = vpop.permute.xlu2 %55  ;;  %348 = vperm.xlu0 %610, %v750_v0  }
  0x61   :  { %598 = vset.pattern.permute.xlu1 %v714_v11  ;;  %226 = vperm.xlu2 %597, %v750_v0  }
  0x62   :  { %222 = vperm.xlu1 %598, %v768_v5  }
  0x65   :  { %v60_v15 = vpop.permute.xlu2 %59  ;;  %613 = vset.pattern.permute.xlu0 %v719_v31 }
  0x66   :  { %405 = vperm.xlu0 %613, %v763_v4  }
  0x69   :  { %601 = vset.pattern.permute.xlu2 %v717_v16 }
  0x6a   :  { %600 = vset.pattern.permute.xlu1 %v717_v16  ;;  %275 = vperm.xlu2 %601, %v768_v5  }
  0x6b   :  { %271 = vperm.xlu1 %600, %v755_v1  }
  0x6e   :  { %v804_v18 = vpop.permute.xlu2 %75  ;;  %616 = vset.pattern.permute.xlu0 %v720_v60 }
  0x6f   :  { %441 = vperm.xlu0 %616, %v755_v1   ;;  %v91_v10 = vmul.f32 %v90_v47, %v804_v18  ;;  %v132_v11 = vmul.f32 %v111_v48, %v804_v18 }
  0x72   :  { %283 = vperm.xlu2 %601, %v763_v4  }
  0x73   :  { %279 = vperm.xlu1 %600, %v750_v0  }
  0x74   :  { %v34_v20 = vpop.permute.xlu1 %33 }
  0x75   :  { %v24_v21 = vpop.permute.xlu0 %23  ;;  %v44_v24 = vmul.f32 %v811_v19, %v34_v20 }
  0x76   :  { %v42_v22 = vmul.f32 %v811_v19, %v24_v21  ;;  %v815_v23 = vpop.permute.xlu2 %83 }
  0x77   :  { %v50_v26 = vmul.f32 1.442695, %v44_v24  ;;  %v134_v18 = vmul.f32 %v111_v48, %v815_v23 }
  0x78   :  { %v46_v25 = vmul.f32 1.442695, %v42_v22  ;;  %v93_v22 = vmul.f32 %v90_v47, %v815_v23 }
  0x7a   :  { %623 = vpow2.f32 %v46_v25  ;;  %604 = vset.pattern.permute.xlu2 %v715_v12 }
  0x7b   :  { %603 = vset.pattern.permute.xlu1 %v715_v12  ;;  %307 = vperm.xlu2 %604, %v750_v0   ;;  %625 = vpow2.f32 %v50_v26 }
  0x7c   :  { %303 = vperm.xlu1 %603, %v768_v5   ;;  %v39_v27 = vpop.permute.xlu1 %38 }
  0x7d   :  { %v45_v28 = vmul.f32 %v811_v19, %v39_v27  ;;  %v29_v29 = vpop.permute.xlu0 %28  ;;  %v721_v27 = vmov 14  }
  0x7e   :  { %v43_v30 = vmul.f32 %v811_v19, %v29_v29  ;;  %620 = vset.pattern.permute.xlu0 %v721_v27 }
  0x7f   :  { %v52_v32 = vmul.f32 1.442695, %v45_v28  ;;  %v101_v33 = vpop.permute.xlu2 %100  ;;  %466 = vperm.xlu0 %620, %v768_v5  }
  0x80   :  { %v624_v34 = vpop.eup %623  ;;  %v48_v35 = vmul.f32 1.442695, %v43_v30  ;;  %v113_v49 = vmul.f32 %v111_v48, %v101_v33  ;;  %v129_v50 = vmul.f32 %v101_v33, %v90_v47 }
  0x81   :  { %627 = vpow2.f32 %v52_v32  ;;  %v70_v36 = vmul.f32 %v624_v34, %v56_v13  ;;  %v626_v37 = vpop.eup %625 }
  0x82   :  { %629 = vpow2.f32 %v48_v35 }
  0x83   :  { %605 = vset.pattern.permute.xlu2 %v716_v14 }
  0x84   :  { %311 = vperm.xlu1 %603, %v763_v4   ;;  %319 = vperm.xlu2 %605, %v755_v1  }
  0x86   :  { %v68_v38 = vpop.permute.xlu1 %67 }
  0x87   :  { %v628_v39 = vpop.eup %627  ;;  %v64_v40 = vpop.permute.xlu0 %63 }
  0x88   :  { %v109_v41 = vpop.permute.xlu2 %108  ;;  %v630_v42 = vpop.eup %629  ;;  %v73_v43 = vmul.f32 %v628_v39, %v68_v38  ;;  %v72_v44 = vmul.f32 %v626_v37, %v64_v40  ;;  %v722_v39 = vmov 12  }
  0x89   :  { %v71_v46 = vmul.f32 %v630_v42, %v60_v15  ;;  %v115_v51 = vmul.f32 %v111_v48, %v109_v41  ;;  %v131_v52 = vmul.f32 %v109_v41, %v90_v47 }
  0x8c   :  { %607 = vset.pattern.permute.xlu1 %v716_v14  ;;  %331 = vperm.xlu2 %605, %v763_v4  }
  0x8d   :  { %327 = vperm.xlu1 %607, %v750_v0  }
  0x8f   :  { %v80_v53 = vpop.permute.xlu1 %79 }
  0x90   :  { %v92_v54 = vmul.f32 %v90_v47, %v80_v53  ;;  %v133_v55 = vmul.f32 %v111_v48, %v80_v53  ;;  %v88_v56 = vpop.permute.xlu0 %87  ;;  %v158_v57 = vpop.permute.xlu2 %157 }
  0x91   :  { %v94_v58 = vmul.f32 %v90_v47, %v88_v56  ;;  %v135_v59 = vmul.f32 %v111_v48, %v88_v56 }
  0x92   :  { %v117_v61 = vsub.f32 %v92_v54, %v113_v49  ;;  %v137_v62 = vadd.f32 %v133_v55, %v129_v50  ;;  %v881_v49 = vperm.slane %v829_v45, 3 }
  0x93   :  { %v119_v63 = vsub.f32 %v94_v58, %v115_v51  ;;  %v139_v2 = vadd.f32 %v135_v59, %v131_v52 }
  0x94   :  { %v837_v3 = vmul.f32 %v117_v61, %v71_v46  ;;  %v839_v6 = vmul.f32 %v137_v62, %v71_v46  ;;  %609 = vset.pattern.permute.xlu2 %v718_v17 }
  0x95   :  { %v842_v7 = vmul.f32 %v119_v63, %v73_v43  ;;  %v844_v8 = vmul.f32 %v139_v2, %v73_v43  ;;  %608 = vset.pattern.permute.xlu1 %v718_v17  ;;  %344 = vperm.xlu2 %609, %v768_v5  }
  0x96   :  { %340 = vperm.xlu1 %608, %v755_v1  }
  0x98   :  { %v97_v9 = vpop.permute.xlu1 %96 }
  0x99   :  { %v112_v12 = vmul.f32 %v111_v48, %v97_v9  ;;  %v128_v13 = vmul.f32 %v97_v9, %v90_v47  ;;  %v851_v14 = vpop.permute.xlu2 %177  ;;  %v150_v33 = vpop.permute.xlu0 %149 }
  0x9a   :  { %v164_v46 = vmul.f32 %v811_v19, %v150_v33 }
  0x9b   :  { %v116_v15 = vsub.f32 %v91_v10, %v112_v12  ;;  %v136_v16 = vadd.f32 %v132_v11, %v128_v13 }
  0x9c   :  { %v168_v51 = vmul.f32 1.442695, %v164_v46 }
  0x9d   :  { %v853_v20 = vmul.f32 %v116_v15, %v70_v36  ;;  %v855_v21 = vmul.f32 %v136_v16, %v70_v36  ;;  %611 = vset.pattern.permute.xlu2 %v719_v31  ;;  %v166_v36 = vmul.f32 %v811_v19, %v158_v57 }
  0x9e   :  { %352 = vperm.xlu1 %608, %v763_v4   ;;  %393 = vperm.xlu2 %611, %v755_v1  }
  0xa0   :  { %v105_v17 = vpop.permute.xlu1 %104 }
  0xa1   :  { %v114_v24 = vmul.f32 %v111_v48, %v105_v17  ;;  %v130_v25 = vmul.f32 %v105_v17, %v90_v47  ;;  %v190_v26 = vpop.permute.xlu2 %189  ;;  %v878_v48 = vperm.slane %v829_v45, 2 }
  0xa2   :  { %v182_v38 = vpop.permute.xlu0 %181 }
  0xa3   :  { %v118_v28 = vsub.f32 %v93_v22, %v114_v24  ;;  %v138_v29 = vadd.f32 %v134_v18, %v130_v25 }
  0xa5   :  { %v122_v30 = vmul.f32 %v118_v28, %v72_v44  ;;  %v142_v32 = vmul.f32 %v138_v29, %v72_v44 }
  0xa6   :  { %612 = vset.pattern.permute.xlu1 %v719_v31  ;;  %401 = vperm.xlu2 %611, %v750_v0   ;;  %v172_v31 = vmul.f32 1.442695, %v166_v36 }
  0xa7   :  { %397 = vperm.xlu1 %612, %v768_v5  }
  0xa9   :  { %v154_v23 = vpop.permute.xlu1 %153 }
  0xaa   :  { %v165_v34 = vmul.f32 %v811_v19, %v154_v23  ;;  %v868_v35 = vpop.permute.xlu2 %201 }
  0xab   :  { %v206_v50 = vpop.permute.xlu0 %205 }
  0xac   :  { %v170_v37 = vmul.f32 1.442695, %v165_v34  ;;  %v215_v54 = vmul.f32 %v878_v48, %v206_v50  ;;  %v256_v55 = vmul.f32 %v881_v49, %v206_v50 }
  0xae   :  { %631 = vpow2.f32 %v170_v37  ;;  %615 = vset.pattern.permute.xlu2 %v722_v39 }
  0xaf   :  { %614 = vset.pattern.permute.xlu1 %v722_v39  ;;  %425 = vperm.xlu2 %615, %v768_v5   ;;  %633 = vpow2.f32 %v172_v31 }
  0xb0   :  { %421 = vperm.xlu1 %614, %v755_v1  }
  0xb1   :  { %v162_v40 = vpop.permute.xlu1 %161 }
  0xb2   :  { %v167_v41 = vmul.f32 %v811_v19, %v162_v40 }
  0xb3   :  { %v219_v42 = vpop.permute.xlu2 %218 }
  0xb4   :  { %v632_v43 = vpop.eup %631  ;;  %v174_v44 = vmul.f32 1.442695, %v167_v41  ;;  %v234_v11 = vmul.f32 %v881_v49, %v219_v42  ;;  %v250_v12 = vmul.f32 %v219_v42, %v878_v48  ;;  %v214_v41 = vmul.f32 %v878_v48, %v868_v35 }
  0xb5   :  { %v875_v47 = vmul.f32 %v632_v43, %v182_v38  ;;  %v634_v52 = vpop.eup %633  ;;  %v255_v42 = vmul.f32 %v881_v49, %v868_v35 }
  0xb6   :  { %635 = vpow2.f32 %v174_v44 }
  0xb7   :  { %433 = vperm.xlu2 %615, %v763_v4   ;;  %637 = vpow2.f32 %v168_v51 }
  0xb8   :  { %429 = vperm.xlu1 %614, %v750_v0  }
  0xba   :  { %v186_v53 = vpop.permute.xlu1 %185 }
  0xbb   :  { %v194_v56 = vmul.f32 %v634_v52, %v186_v53  ;;  %v227_v57 = vpop.permute.xlu2 %226 }
  0xbc   :  { %v636_v58 = vpop.eup %635  ;;  %v236_v59 = vmul.f32 %v881_v49, %v227_v57  ;;  %v252_v61 = vmul.f32 %v227_v57, %v878_v48 }
  0xbd   :  { %v195_v62 = vmul.f32 %v636_v58, %v190_v26  ;;  %v638_v16 = vpop.eup %637 }
  0xbe   :  { %v240_v63 = vsub.f32 %v215_v54, %v236_v59  ;;  %v260_v2 = vadd.f32 %v256_v55, %v252_v61 }
  0xbf   :  { %618 = vset.pattern.permute.xlu2 %v720_v60 }
  0xc0   :  { %v244_v9 = vmul.f32 %v240_v63, %v194_v56  ;;  %v264_v10 = vmul.f32 %v260_v2, %v194_v56  ;;  %617 = vset.pattern.permute.xlu1 %v720_v60  ;;  %449 = vperm.xlu2 %618, %v750_v0   ;;  %v192_v60 = vmul.f32 %v638_v16, %v851_v14 }
  0xc1   :  { %445 = vperm.xlu1 %617, %v768_v5   ;;  %v231_v5 = vpop.permute.xlu0 %230 }
  0xc2   :  { %v895_v13 = vadd.f32 %v244_v9, %v122_v30  ;;  %v897_v15 = vadd.f32 %v264_v10, %v142_v32  ;;  %v237_v33 = vmul.f32 %v881_v49, %v231_v5  ;;  %v253_v14 = vmul.f32 %v231_v5, %v878_v48 }
  0xc3   :  { %v198_v17 = vpop.permute.xlu1 %197 }
  0xc4   :  { %v213_v22 = vmul.f32 %v878_v48, %v198_v17  ;;  %v254_v18 = vmul.f32 %v881_v49, %v198_v17  ;;  %v276_v24 = vpop.permute.xlu2 %275 }
  0xc5   :  { %v287_v35 = vmul.f32 %v811_v19, %v276_v24 }
  0xc6   :  { %v238_v25 = vsub.f32 %v213_v22, %v234_v11  ;;  %v258_v26 = vadd.f32 %v254_v18, %v250_v12 }
  0xc8   :  { %v242_v28 = vmul.f32 %v238_v25, %v192_v60  ;;  %v262_v29 = vmul.f32 %v258_v26, %v192_v60  ;;  %619 = vset.pattern.permute.xlu2 %v721_v27 }
  0xc9   :  { %453 = vperm.xlu1 %617, %v763_v4   ;;  %462 = vperm.xlu2 %619, %v755_v1   ;;  %v937_v53 = vpop.permute.xlu0 %299 }
  0xca   :  { %v906_v30 = vadd.f32 %v242_v28, %v853_v20  ;;  %v909_v32 = vadd.f32 %v262_v29, %v855_v21 }
  0xcb   :  { %v210_v23 = vpop.permute.xlu1 %209 }
  0xcc   :  { %v216_v34 = vmul.f32 %v878_v48, %v210_v23  ;;  %v257_v36 = vmul.f32 %v881_v49, %v210_v23  ;;  %v284_v37 = vpop.permute.xlu2 %283 }
  0xcd   :  { %v289_v56 = vmul.f32 %v811_v19, %v284_v37 }
  0xce   :  { %v241_v38 = vsub.f32 %v216_v34, %v237_v33  ;;  %v261_v39 = vadd.f32 %v257_v36, %v253_v14 }
  0xcf   :  { %v296_v58 = vmul.f32 1.442695, %v289_v56 }
  0xd0   :  { %v245_v31 = vmul.f32 %v241_v38, %v195_v62  ;;  %v265_v1 = vmul.f32 %v261_v39, %v195_v62 }
  0xd1   :  { %621 = vset.pattern.permute.xlu1 %v721_v27  ;;  %474 = vperm.xlu2 %619, %v763_v4   ;;  %v324_v57 = vpop.permute.xlu0 %323 }
  0xd2   :  { %v918_v20 = vadd.f32 %v245_v31, %v842_v7  ;;  %v921_v21 = vadd.f32 %v265_v1, %v844_v8  ;;  %470 = vperm.xlu1 %621, %v750_v0  }
  0xd4   :  { %v223_v40 = vpop.permute.xlu1 %222 }
  0xd5   :  { %v235_v43 = vmul.f32 %v881_v49, %v223_v40  ;;  %v251_v27 = vmul.f32 %v223_v40, %v878_v48  ;;  %v308_v4 = vpop.permute.xlu2 %307  ;;  %v292_v49 = vmul.f32 1.442695, %v287_v35 }
  0xd7   :  { %v239_v44 = vsub.f32 %v214_v41, %v235_v43  ;;  %v259_v7 = vadd.f32 %v255_v42, %v251_v27  ;;  %639 = vpow2.f32 %v292_v49 }
  0xd9   :  { %v243_v46 = vmul.f32 %v239_v44, %v875_v47  ;;  %v263_v8 = vmul.f32 %v259_v7, %v875_v47  ;;  %v349_v33 = vpop.permute.xlu0 %348 }
  0xdb   :  { %v247_v0 = vadd.f32 %v243_v46, %v837_v3  ;;  %v267_v50 = vadd.f32 %v263_v8, %v839_v6  ;;  %v942_v3 = vperm.slane %v829_v45, 4  ;;  %v945_v6 = vperm.slane %v829_v45, 5 }
  0xdd   :  { %v272_v51 = vpop.permute.xlu1 %271  ;;  %v640_v59 = vpop.eup %639  ;;  %v336_v62 = vmul.f32 %v942_v3, %v324_v57  ;;  %v377_v63 = vmul.f32 %v945_v6, %v324_v57  ;;  %v358_v14 = vmul.f32 %v945_v6, %v349_v33  ;;  %v374_v23 = vmul.f32 %v349_v33, %v942_v3 }
  0xde   :  { %v934_v52 = vpop.permute.xlu2 %319 }
  0xe5   :  { %v280_v48 = vpop.permute.xlu1 %279 }
  0xe6   :  { %v288_v54 = vmul.f32 %v811_v19, %v280_v48  ;;  %v332_v55 = vpop.permute.xlu2 %331 }
  0xe7   :  { %v338_v7 = vmul.f32 %v942_v3, %v332_v55  ;;  %v379_v46 = vmul.f32 %v945_v6, %v332_v55  ;;  %v406_v55 = vpop.permute.xlu0 %405 }
  0xe8   :  { %v294_v47 = vmul.f32 1.442695, %v288_v54 }
  0xea   :  { %641 = vpow2.f32 %v294_v47 }
  0xeb   :  { %643 = vpow2.f32 %v296_v58 }
  0xee   :  { %v304_v61 = vpop.permute.xlu1 %303 }
  0xef   :  { %v315_v2 = vmul.f32 %v640_v59, %v304_v61  ;;  %v345_v9 = vpop.permute.xlu2 %344 }
  0xf0   :  { %v642_v10 = vpop.eup %641  ;;  %v357_v11 = vmul.f32 %v945_v6, %v345_v9  ;;  %v373_v12 = vmul.f32 %v345_v9, %v942_v3  ;;  %v442_v9 = vpop.permute.xlu0 %441 }
  0xf1   :  { %v316_v16 = vmul.f32 %v642_v10, %v308_v4  ;;  %v644_v60 = vpop.eup %643  ;;  %v286_v4 = vmul.f32 %v811_v19, %v272_v51 }
  0xf2   :  { %v361_v17 = vsub.f32 %v336_v62, %v357_v11  ;;  %v381_v22 = vadd.f32 %v377_v63, %v373_v12  ;;  %v335_v62 = vmul.f32 %v942_v3, %v934_v52  ;;  %v992_v63 = vperm.slane %v829_v45, 6 }
  0xf4   :  { %v365_v18 = vmul.f32 %v361_v17, %v315_v2  ;;  %v385_v24 = vmul.f32 %v381_v22, %v315_v2  ;;  %v457_v17 = vmul.f32 %v992_v63, %v442_v9 }
  0xf6   :  { %v951_v25 = vadd.f32 %v365_v18, %v247_v0  ;;  %v953_v26 = vadd.f32 %v385_v24, %v267_v50  ;;  %v312_v5 = vpop.permute.xlu1 %311 }
  0xf7   :  { %v317_v28 = vmul.f32 %v644_v60, %v312_v5 }
  0xf8   :  { %v394_v29 = vpop.permute.xlu2 %393 }
  0xf9   :  { %v408_v54 = vmul.f32 %v811_v19, %v394_v29 }
  0xfb   :  { %v412_v58 = vmul.f32 1.442695, %v408_v54 }
  0xff   :  { %v328_v34 = vpop.permute.xlu1 %327 }
 0x100   :  { %v337_v36 = vmul.f32 %v942_v3, %v328_v34  ;;  %v378_v37 = vmul.f32 %v945_v6, %v328_v34  ;;  %v959_v38 = vpop.permute.xlu2 %401 }
 0x102   :  { %v362_v39 = vsub.f32 %v337_v36, %v358_v14  ;;  %v382_v31 = vadd.f32 %v378_v37, %v374_v23 }
 0x104   :  { %v366_v1 = vmul.f32 %v362_v39, %v316_v16  ;;  %v386_v40 = vmul.f32 %v382_v31, %v316_v16  ;;  %v411_v31 = vmul.f32 %v811_v19, %v406_v55 }
 0x106   :  { %v962_v41 = vadd.f32 %v366_v1, %v895_v13  ;;  %v965_v42 = vadd.f32 %v386_v40, %v897_v15  ;;  %v290_v15 = vmul.f32 1.442695, %v286_v4  ;;  %v467_v1 = vpop.permute.xlu0 %466  ;;  %v418_v40 = vmul.f32 1.442695, %v411_v31 }
 0x107   :  { %v495_v4 = vmul.f32 %v467_v1, %v992_v63 }
 0x108   :  { %v341_v43 = vpop.permute.xlu1 %340  ;;  %645 = vpow2.f32 %v290_v15 }
 0x109   :  { %v967_v27 = vpop.permute.xlu2 %425  ;;  %v356_v59 = vmul.f32 %v945_v6, %v341_v43  ;;  %v372_v61 = vmul.f32 %v341_v43, %v942_v3  ;;  %647 = vpow2.f32 %v412_v58 }
 0x10b   :  { %v360_v10 = vsub.f32 %v335_v62, %v356_v59 }
 0x10e   :  { %v646_v2 = vpop.eup %645 }
 0x10f   :  { %v314_v12 = vmul.f32 %v646_v2, %v937_v53  ;;  %v648_v24 = vpop.eup %647 }
 0x110   :  { %v353_v44 = vpop.permute.xlu1 %352 }
 0x111   :  { %v359_v8 = vmul.f32 %v945_v6, %v353_v44  ;;  %v375_v0 = vmul.f32 %v353_v44, %v942_v3  ;;  %v974_v50 = vpop.permute.xlu2 %433 }
 0x113   :  { %v363_v13 = vsub.f32 %v338_v7, %v359_v8  ;;  %v383_v35 = vadd.f32 %v379_v46, %v375_v0 }
 0x115   :  { %v367_v49 = vmul.f32 %v363_v13, %v317_v28  ;;  %v387_v48 = vmul.f32 %v383_v35, %v317_v28  ;;  %v410_v35 = vmul.f32 %v811_v19, %v959_v38 }
 0x117   :  { %v978_v51 = vadd.f32 %v367_v49, %v918_v20  ;;  %v981_v56 = vadd.f32 %v387_v48, %v921_v21  ;;  %v376_v20 = vmul.f32 %v945_v6, %v934_v52  ;;  %v995_v21 = vperm.slane %v829_v45, 7 }
 0x118   :  { %v364_v52 = vmul.f32 %v360_v10, %v314_v12 }
 0x119   :  { %v398_v47 = vpop.permute.xlu1 %397  ;;  %v380_v11 = vadd.f32 %v376_v20, %v372_v61  ;;  %v498_v3 = vmul.f32 %v995_v21, %v442_v9  ;;  %v479_v43 = vmul.f32 %v995_v21, %v467_v1  ;;  %v416_v61 = vmul.f32 1.442695, %v410_v35 }
 0x11a   :  { %v983_v57 = vpop.permute.xlu2 %449  ;;  %v409_v60 = vmul.f32 %v811_v19, %v398_v47  ;;  %v368_v53 = vadd.f32 %v364_v52, %v906_v30 }
 0x11b   :  { %v384_v6 = vmul.f32 %v380_v11, %v314_v12  ;;  %v459_v11 = vmul.f32 %v992_v63, %v983_v57  ;;  %v500_v12 = vmul.f32 %v995_v21, %v983_v57 }
 0x11c   :  { %v414_v34 = vmul.f32 1.442695, %v409_v60 }
 0x11d   :  { %v388_v33 = vadd.f32 %v384_v6, %v909_v32 }
 0x11e   :  { %649 = vpow2.f32 %v414_v34 }
 0x11f   :  { %651 = vpow2.f32 %v418_v40 }
 0x120   :  { %653 = vpow2.f32 %v416_v61 }
 0x122   :  { %v422_v16 = vpop.permute.xlu1 %421 }
 0x123   :  { %v463_v22 = vpop.permute.xlu2 %462  ;;  %v436_v5 = vmul.f32 %v648_v24, %v422_v16 }
 0x124   :  { %v478_v18 = vmul.f32 %v995_v21, %v463_v22  ;;  %v494_v45 = vmul.f32 %v463_v22, %v992_v63  ;;  %v650_v30 = vpop.eup %649 }
 0x125   :  { %v437_v46 = vmul.f32 %v650_v30, %v967_v27  ;;  %v652_v58 = vpop.eup %651 }
 0x126   :  { %v482_v28 = vsub.f32 %v457_v17, %v478_v18  ;;  %v502_v29 = vadd.f32 %v498_v3, %v494_v45  ;;  %v439_v19 = vmul.f32 %v652_v58, %v974_v50  ;;  %v654_v17 = vpop.eup %653 }
 0x128   :  { %v486_v14 = vmul.f32 %v482_v28, %v436_v5  ;;  %v506_v23 = vmul.f32 %v502_v29, %v436_v5 }
 0x12a   :  { %v490_v36 = vadd.f32 %v486_v14, %v368_v53  ;;  %v510_v37 = vadd.f32 %v506_v23, %v388_v33  ;;  %v430_v39 = vpop.permute.xlu1 %429 }
 0x12b   :  { %v475_v13 = vpop.permute.xlu2 %474  ;;  %v438_v3 = vmul.f32 %v654_v17, %v430_v39 }
 0x12c   :  { %514 = vst [vmem:[#allocation2] sm:$0xff] %v490_v36  ;;  %v481_v55 = vmul.f32 %v995_v21, %v475_v13  ;;  %v497_v47 = vmul.f32 %v475_v13, %v992_v63 }
 0x12d   :  { %518 = vst [vmem:[#allocation4] sm:$0xff] %v510_v37 }
 0x133   :  { %v446_v44 = vpop.permute.xlu1 %445 }
 0x134   :  { %v458_v32 = vmul.f32 %v992_v63, %v446_v44  ;;  %v499_v7 = vmul.f32 %v995_v21, %v446_v44 }
 0x136   :  { %v483_v8 = vsub.f32 %v458_v32, %v479_v43  ;;  %v503_v0 = vadd.f32 %v499_v7, %v495_v4 }
 0x138   :  { %v487_v15 = vmul.f32 %v483_v8, %v437_v46  ;;  %v507_v49 = vmul.f32 %v503_v0, %v437_v46 }
 0x13a   :  { %v491_v48 = vadd.f32 %v487_v15, %v951_v25  ;;  %v511_v54 = vadd.f32 %v507_v49, %v953_v26 }
 0x13b   :  { %v454_v59 = vpop.permute.xlu1 %453 }
 0x13c   :  { %515 = vst [vmem:[#allocation2 + $0x8] sm:$0xff] %v491_v48  ;;  %v460_v27 = vmul.f32 %v992_v63, %v454_v59  ;;  %v501_v62 = vmul.f32 %v995_v21, %v454_v59 }
 0x13d   :  { %519 = vst [vmem:[#allocation4 + $0x8] sm:$0xff] %v511_v54 }
 0x13e   :  { %v485_v38 = vsub.f32 %v460_v27, %v481_v55  ;;  %v505_v20 = vadd.f32 %v501_v62, %v497_v47 }
 0x140   :  { %v489_v25 = vmul.f32 %v485_v38, %v439_v19  ;;  %v509_v26 = vmul.f32 %v505_v20, %v439_v19 }
 0x142   :  { %v493_v2 = vadd.f32 %v489_v25, %v978_v51  ;;  %v513_v9 = vadd.f32 %v509_v26, %v981_v56 }
 0x144   :  { %517 = vst [vmem:[#allocation2 + $0x18] sm:$0xff] %v493_v2  ;;  %v471_v10 = vpop.permute.xlu1 %470 }
 0x145   :  { %521 = vst [vmem:[#allocation4 + $0x18] sm:$0xff] %v513_v9  ;;  %v480_v50 = vmul.f32 %v995_v21, %v471_v10  ;;  %v496_v16 = vmul.f32 %v471_v10, %v992_v63 }
 0x147   :  { %v484_v22 = vsub.f32 %v459_v11, %v480_v50  ;;  %v504_v52 = vadd.f32 %v500_v12, %v496_v16 }
 0x149   :  { %v488_v51 = vmul.f32 %v484_v22, %v438_v3  ;;  %v508_v56 = vmul.f32 %v504_v52, %v438_v3 }
 0x14b   :  { %v492_v57 = vadd.f32 %v488_v51, %v962_v41  ;;  %v512_v63 = vadd.f32 %v508_v56, %v965_v42 }
 0x14d   :  { %516 = vst [vmem:[#allocation2 + $0x10] sm:$0xff] %v492_v57 }
 0x14e   :  { %520 = vst [vmem:[#allocation4 + $0x10] sm:$0xff] %v512_v63  ;;  %534 = dma.vmem_to_hbm [thread:$0]  %s527_s23, 512, %s529_s26, [#allocation3], %s725_s5, %s725_s5, %s726_s2  }
 0x14f   :  { %547 = dma.vmem_to_hbm [thread:$0]  %s540_s28, 512, %s542_s4, [#allocation5], %s725_s5, %s725_s5, %s726_s2  }
 0x150   :  { %703 = dma.done.wait [#allocation3], 512  }
 0x151   :  { %704 = vsyncadd [#allocation3], 4294966784 }
 0x152   :  { %705 = dma.done.wait [#allocation5], 512  }
 0x153   :  { %706 = vsyncadd [#allocation5], 4294966784 }
 0x154   :  { %556 = vsyncpa [#allocation3], 1 }
 0x155   :  { %557 = vsyncpa [#allocation5], 1 }

</bundles_post_ra>
